<compile_context>
chip_gen: v7x
topology: tpu7x:2x2x1
jax: 0.10.0
libtpu: 0.0.40
codegen_flags: <defaults>
</compile_context>

<pallas_src>
import functools

import jax
import jax.numpy as jnp
from jax.experimental import pallas as pl
from jax.experimental.pallas import tpu as pltpu

LANE = 128      # lane width (last-dim tile)
MAX_TM = 2048   # max sublane rows per grid step (2048*128*4B = 1 MiB per input)


def _l2_kernel(x_ref, t_ref, out_ref, acc_ref, *,
               steps_per_shard, total_blocks, rows_per_block, n_rows,
               needs_mask):
    c = pl.program_id(0)   # shard ("parallel" axis)
    i = pl.program_id(1)   # reduction step within shard ("arbitrary" axis)

    @pl.when(i == 0)
    def _():
        acc_ref[...] = jnp.zeros_like(acc_ref)

    def squared_diff():
        d = t_ref[...].astype(jnp.float32) - x_ref[...].astype(jnp.float32)
        return d * d

    if needs_mask:
        global_block = c * steps_per_shard + i
        # Only the last real block (and fully-out-of-range overrun blocks that
        # the index_map clamps back onto it) can contain invalid rows.
        is_edge = global_block >= (total_blocks - 1)

        @pl.when(jnp.logical_not(is_edge))
        def _():
            acc_ref[...] += squared_diff()

        @pl.when(is_edge)
        def _():
            sq = squared_diff()
            base_row = global_block * rows_per_block
            row_ids = jax.lax.broadcasted_iota(jnp.int32, sq.shape, 0)
            valid = (base_row + row_ids) < n_rows
            acc_ref[...] += jnp.where(valid, sq, jnp.float32(0.0))
    else:
        acc_ref[...] += squared_diff()

    @pl.when(i == pl.num_programs(1) - 1)
    def _():
        # Single cross-lane/sublane reduction per shard (epilogue only).
        out_ref[0, 0] = jnp.sum(acc_ref[...])


def l2_loss(input, target):
    """MSE = mean((target - input)^2) over all elements, returned as f32 scalar."""
    assert input.shape == target.shape, "input/target shapes must match"
    n = input.size
    assert n > 0

    flat_x = input.reshape(-1)
    flat_t = target.reshape(-1)

    # Pad only the ragged (<128-element) lane tail; zeros contribute 0 to the
    # sum while the divisor below stays the true element count n.
    rem = n % LANE
    if rem:
        pad = LANE - rem
        flat_x = jnp.pad(flat_x, (0, pad))
        flat_t = jnp.pad(flat_t, (0, pad))

    n_rows = flat_x.size // LANE
    x2 = flat_x.reshape(n_rows, LANE)
    t2 = flat_t.reshape(n_rows, LANE)

    rows_per_block = min(MAX_TM, n_rows)
    total_blocks = pl.cdiv(n_rows, rows_per_block)
    num_shards = 2 if total_blocks >= 2 else 1
    steps_per_shard = pl.cdiv(total_blocks, num_shards)
    # Masking is needed iff the last block is partial or a shard overruns.
    needs_mask = (n_rows % rows_per_block != 0) or (
        num_shards * steps_per_shard != total_blocks)

    def in_index_map(c, i):
        # Clamp overrun steps onto the last real block; their rows are masked
        # off inside the kernel, so they contribute exactly zero.
        blk = c * steps_per_shard + i
        return (jnp.minimum(blk, total_blocks - 1), 0)

    kernel = functools.partial(
        _l2_kernel,
        steps_per_shard=steps_per_shard,
        total_blocks=total_blocks,
        rows_per_block=rows_per_block,
        n_rows=n_rows,
        needs_mask=needs_mask,
    )

    partials = pl.pallas_call(
        kernel,
        out_shape=jax.ShapeDtypeStruct((num_shards, 1), jnp.float32),
        grid=(num_shards, steps_per_shard),
        in_specs=[
            pl.BlockSpec((rows_per_block, LANE), in_index_map),
            pl.BlockSpec((rows_per_block, LANE), in_index_map),
        ],
        out_specs=pl.BlockSpec(
            (1, 1), lambda c, i: (c, 0), memory_space=pltpu.MemorySpace.SMEM
        ),
        scratch_shapes=[pltpu.VMEM((rows_per_block, LANE), jnp.float32)],
        compiler_params=pltpu.CompilerParams(
            dimension_semantics=("parallel", "arbitrary")
        ),
    )(x2, t2)

    return jnp.sum(partials) / jnp.float32(n)


if __name__ == "__main__":
    key = jax.random.PRNGKey(0)
    k1, k2, k3, k4 = jax.random.split(key, 4)

    # Small NCHW-shaped example (L2Loss is shape-agnostic).
    x = jax.random.normal(k1, (2, 4, 16, 16), dtype=jnp.float32)
    t = jax.random.normal(k2, (2, 4, 16, 16), dtype=jnp.float32)
    loss = l2_loss(x, t)
    jax.block_until_ready(loss)
    ref = jnp.mean((t - x) ** 2)
    assert jnp.allclose(loss, ref, rtol=1e-6, atol=1e-6), (loss, ref)

    # Odd-sized input exercising the lane-tail pad, multi-block tail mask and
    # the 2-shard ("parallel") split.
    x2 = jax.random.normal(k3, (1, 3, 300, 301), dtype=jnp.float32)
    t2 = jax.random.normal(k4, (1, 3, 300, 301), dtype=jnp.float32)
    loss2 = l2_loss(x2, t2)
    jax.block_until_ready(loss2)
    ref2 = jnp.mean((t2 - x2) ** 2)
    assert jnp.allclose(loss2, ref2, rtol=1e-5, atol=1e-6), (loss2, ref2)

    print("KERNEL_OK")
</pallas_src>

<mosaic_0001>
module attributes {stable_mosaic.version = 11 : i64} {
  func.func @_l2_kernel(%arg0: i32, %arg1: i32, %arg2: memref<16x128xf32, #tpu.memory_space<vmem>>, %arg3: memref<16x128xf32, #tpu.memory_space<vmem>>, %arg4: memref<1x1xf32, #tpu.memory_space<smem>>, %arg5: memref<16x128xf32, #tpu.memory_space<vmem>>) attributes {dimension_semantics = [#tpu.dimension_semantics<parallel>, #tpu.dimension_semantics<arbitrary>], iteration_bounds = array<i64: 1, 1>, scalar_prefetch = 0 : i64, scratch_operands = 1 : i64, tpu.core_type = #tpu.core_type<tc>, window_params = [{transform_indices = @transform_0, window_bounds = array<i64: 16, 128>}, {transform_indices = @transform_1, window_bounds = array<i64: 16, 128>}, {transform_indices = @transform_2, window_bounds = array<i64: 1, 1>}]} {
    %c0_i32 = arith.constant 0 : i32
    %0 = arith.cmpi eq, %arg1, %c0_i32 : i32
    %1 = arith.extui %0 : i1 to i32
    %c0_i32_0 = arith.constant 0 : i32
    %2 = arith.cmpi ne, %1, %c0_i32_0 : i32
    scf.if %2 {
      %cst = arith.constant 0.000000e+00 : f32
      %13 = vector.broadcast %cst : f32 to vector<16x128xf32>
      %c0_10 = arith.constant 0 : index
      %c0_11 = arith.constant 0 : index
      %14 = vector.load %arg5[%c0_10, %c0_11] : memref<16x128xf32, #tpu.memory_space<vmem>>, vector<16x128xf32>
      tpu.vector_store %arg5[%c0_10, %c0_11], %13 {strides = array<i32>} : memref<16x128xf32, #tpu.memory_space<vmem>>, vector<16x128xf32>,
    } else {
    }
    %c0 = arith.constant 0 : index
    %c0_1 = arith.constant 0 : index
    %3 = vector.load %arg5[%c0, %c0_1] : memref<16x128xf32, #tpu.memory_space<vmem>>, vector<16x128xf32>
    %c0_2 = arith.constant 0 : index
    %c0_3 = arith.constant 0 : index
    %4 = vector.load %arg3[%c0_2, %c0_3] : memref<16x128xf32, #tpu.memory_space<vmem>>, vector<16x128xf32>
    %c0_4 = arith.constant 0 : index
    %c0_5 = arith.constant 0 : index
    %5 = vector.load %arg2[%c0_4, %c0_5] : memref<16x128xf32, #tpu.memory_space<vmem>>, vector<16x128xf32>
    %6 = arith.subf %4, %5 : vector<16x128xf32>
    %7 = arith.mulf %6, %6 : vector<16x128xf32>
    %8 = arith.addf %3, %7 : vector<16x128xf32>
    %c0_6 = arith.constant 0 : index
    %c0_7 = arith.constant 0 : index
    %9 = vector.load %arg5[%c0_6, %c0_7] : memref<16x128xf32, #tpu.memory_space<vmem>>, vector<16x128xf32>
    tpu.vector_store %arg5[%c0_6, %c0_7], %8 {strides = array<i32>} : memref<16x128xf32, #tpu.memory_space<vmem>>, vector<16x128xf32>,
    %c0_i32_8 = arith.constant 0 : i32
    %10 = arith.cmpi eq, %arg1, %c0_i32_8 : i32
    %11 = arith.extui %10 : i1 to i32
    %c0_i32_9 = arith.constant 0 : i32
    %12 = arith.cmpi ne, %11, %c0_i32_9 : i32
    scf.if %12 {
      %c0_10 = arith.constant 0 : index
      %c0_11 = arith.constant 0 : index
      %13 = vector.load %arg5[%c0_10, %c0_11] : memref<16x128xf32, #tpu.memory_space<vmem>>, vector<16x128xf32>
      %14 = vector.shape_cast %13 : vector<16x128xf32> to vector<1x16x128xf32>
      %cst = arith.constant dense<0.000000e+00> : vector<1xf32>
      %15 = vector.multi_reduction <add>, %14, %cst [1, 2] : vector<1x16x128xf32> to vector<1xf32>
      %16 = vector.shape_cast %15 : vector<1xf32> to vector<1x1x1xf32>
      %17 = vector.extract %16[0, 0, 0] : f32 from vector<1x1x1xf32>
      %c0_12 = arith.constant 0 : index
      %c0_13 = arith.constant 0 : index
      %18 = memref.load %arg4[%c0_12, %c0_13] : memref<1x1xf32, #tpu.memory_space<smem>>
      memref.store %17, %arg4[%c0_12, %c0_13] : memref<1x1xf32, #tpu.memory_space<smem>>
    } else {
    }
    return
  }
  func.func @transform_0(%arg0: i32, %arg1: i32) -> (i32, i32) {
    %c1_i32 = arith.constant 1 : i32
    %0 = arith.muli %arg0, %c1_i32 : i32
    %1 = arith.addi %0, %arg1 : i32
    %c0_i32 = arith.constant 0 : i32
    %2 = arith.minsi %1, %c0_i32 : i32
    %c0_i32_0 = arith.constant 0 : i32
    %c0_i32_1 = arith.constant 0 : i32
    return %2, %c0_i32_0 : i32, i32
  }
  func.func @transform_1(%arg0: i32, %arg1: i32) -> (i32, i32) {
    %c1_i32 = arith.constant 1 : i32
    %0 = arith.muli %arg0, %c1_i32 : i32
    %1 = arith.addi %0, %arg1 : i32
    %c0_i32 = arith.constant 0 : i32
    %2 = arith.minsi %1, %c0_i32 : i32
    %c0_i32_0 = arith.constant 0 : i32
    %c0_i32_1 = arith.constant 0 : i32
    return %2, %c0_i32_0 : i32, i32
  }
  func.func @transform_2(%arg0: i32, %arg1: i32) -> (i32, i32) {
    %c0_i32 = arith.constant 0 : i32
    %c0_i32_0 = arith.constant 0 : i32
    return %arg0, %c0_i32 : i32, i32
  }
}

</mosaic_0001>

<bundles_post_ra>
// kernel: tpu_custom_call.1
= control target key start
LH: loop header
LB: loop body
LE: loop exit
PB: predicated region body
PF: predicated region fallthrough
CT: control target
= control target key end

     0   :  { %7 = vsyncpa [#allocation4], 0  ;;  %s239_s0 = inlined_call_operand.hbm [shape: f32[16,128], index: 0, kind: input, shape index: {}]   ;;  %s240_s1 = inlined_call_operand.hbm [shape: f32[16,128], index: 1, kind: input, shape index: {}]   ;;  %s241_s2 = inlined_call_operand.hbm [shape: f32[1,1], index: 2, kind: output, shape index: {}]  }
   0x1   :  { %8 = vsyncpa [#allocation7], 0 }
   0x2   :  { %9 = vsyncpa [#allocation5], 0  ;;  %s183_s9 = smov [#allocation3]   ;;  %s123_s13 = scalar_lea.hbm %s239_s0, 256 }
   0x3   :  { %s21_s10 = sshll.u32 %s183_s9, 4  ;;  %p124_p0 = scmp.ne.s32.totalorder %s239_s0, %s123_s13  ;;  %s22_s10 = int_to_ptr.vmem [resolvable:$true] %s21_s10 }
   0x4   :  { %p127_p1 = scmp.lt.u32.totalorder %s123_s13, %s239_s0 }
   0x6   :  { %p129_p2 = pnand %p127_p1, %p124_p0 }
   0x8   :  { %132 = shalt.err (!%p129_p2)
}
   0x9   :  { %s133_s18 = scalar_lea.vmem %s22_s10, 256  ;;  %p138_p4 = scmp.lt.s32.totalorder %s22_s10, %s22_s10 }
   0xa   :  { %p134_p3 = scmp.ne.s32.totalorder %s22_s10, %s133_s18  ;;  %p139_p5 = scmp.lt.s32.totalorder %s133_s18, %s133_s18 }
   0xc   :  { %p140_p6 = por %p139_p5, %p138_p4 }
   0xe   :  { %p141_p7 = pnand %p140_p6, %p134_p3 }
  0x10   :  { %144 = shalt.err (!%p141_p7)
}
  0x11   :  { %s184_s19 = smov 128   ;;  %s185_s20 = smov 8  }
  0x12   :  { %27 = dma.hbm_to_vmem [thread:$0]  %s239_s0, 256, %s22_s10, [#allocation4], %s184_s19, %s184_s19, %s185_s20  }
  0x13   :  { %s186_s23 = smov [#allocation6]   ;;  %s145_s27 = scalar_lea.hbm %s240_s1, 256 }
  0x14   :  { %s39_s24 = sshll.u32 %s186_s23, 4  ;;  %p146_p8 = scmp.ne.s32.totalorder %s240_s1, %s145_s27  ;;  %s40_s24 = int_to_ptr.vmem [resolvable:$true] %s39_s24 }
  0x15   :  { %p149_p9 = scmp.lt.u32.totalorder %s145_s27, %s240_s1 }
  0x17   :  { %p151_p10 = pnand %p149_p9, %p146_p8 }
  0x19   :  { %154 = shalt.err (!%p151_p10)
}
  0x1a   :  { %s155_s4 = scalar_lea.vmem %s40_s24, 256  ;;  %p160_p12 = scmp.lt.s32.totalorder %s40_s24, %s40_s24 }
  0x1b   :  { %p156_p11 = scmp.ne.s32.totalorder %s40_s24, %s155_s4  ;;  %p161_p13 = scmp.lt.s32.totalorder %s155_s4, %s155_s4 }
  0x1d   :  { %p162_p0 = por %p161_p13, %p160_p12 }
  0x1f   :  { %p163_p1 = pnand %p162_p0, %p156_p11 }
  0x21   :  { %166 = shalt.err (!%p163_p1)
}
  0x22   :  { %45 = dma.hbm_to_vmem [thread:$0]  %s240_s1, 256, %s40_s24, [#allocation7], %s184_s19, %s184_s19, %s185_s20  }
  0x23   :  { %177 = dma.done.wait [#allocation4], 256  }
  0x24   :  { %178 = vsyncadd [#allocation4], 4294967040 }
  0x25   :  { %179 = dma.done.wait [#allocation7], 256  }
  0x26   :  { %180 = vsyncadd [#allocation7], 4294967040  ;;  %v68_v0 = vld [vmem:[#allocation6] sm:$0xff]  ;;  %v69_v1 = vld [vmem:[#allocation6 + $0x8] sm:$0xff]  ;;  %s167_s8 = scalar_lea.hbm %s241_s2, 16 }
  0x27   :  { %v70_v2 = vld [vmem:[#allocation3] sm:$0xff]  ;;  %v71_v3 = vld [vmem:[#allocation3 + $0x8] sm:$0xff]  ;;  %p168_p2 = scmp.ne.s32.totalorder %s241_s2, %s167_s8  ;;  %p171_p3 = scmp.lt.u32.totalorder %s167_s8, %s241_s2 }
  0x28   :  { %v72_v4 = vsub.f32 %v68_v0, %v70_v2  ;;  %v73_v5 = vsub.f32 %v69_v1, %v71_v3 }
  0x29   :  { %p173_p4 = pnand %p171_p3, %p168_p2 }
  0x2a   :  { %v74_v6 = vmul.f32 %v72_v4, %v72_v4  ;;  %v75_v7 = vmul.f32 %v73_v5, %v73_v5 }
  0x2c   :  { %v85_v8 = vadd.f32 %v75_v7, %v74_v6 }
  0x2e   :  { %86 = vadd.xlane.f32.xlu0 %v85_v8 }
  0xbb   :  { %v87_v9 = vpop.xlane.xlu0 %86 }
  0xbc   :  { %v88_v10 = vrot.slane %v87_v9, 4 }
  0xbe   :  { %v89_v11 = vadd.f32 %v88_v10, %v87_v9 }
  0xc0   :  { %v90_v12 = vrot.slane %v89_v11, 2 }
  0xc2   :  { %v91_v13 = vadd.f32 %v90_v12, %v89_v11 }
  0xc4   :  { %v92_v14 = vrot.slane %v91_v13, 1 }
  0xc6   :  { %v93_v15 = vadd.f32 %v92_v14, %v91_v13 }
  0xc8   :  { %116 = vpush %v93_v15 }
  0xf9   :  { %s117_s1 = spop %116 }
  0xfa   :  { %96 = sst [smem:[#allocation8]] %s117_s1 }
  0xfb   :  { %176 = shalt.err (!%p173_p4)
}
  0xfc   :  { %s187_s13 = smov [#allocation8]  }
  0xfd   :  { %104 = dma.smem_to_hbm %s187_s13, 16, %s241_s2, [#allocation5]  }
  0xfe   :  { %181 = dma.done.wait [#allocation5], 16  }
  0xff   :  { %182 = vsyncadd [#allocation5], 4294967280 }
 0x100   :  { %108 = sfence }
 0x101   :  { %109 = vsyncpa [#allocation4], 1 }
 0x102   :  { %110 = vsyncpa [#allocation7], 1 }
 0x103   :  { %111 = vsyncpa [#allocation5], 1 }

</bundles_post_ra>
